<compile_context>
chip_gen: v7x
topology: tpu7x:2x2x1
jax: 0.10.0
libtpu: 0.0.40
codegen_flags: <defaults>
</compile_context>

<pallas_src>
import jax
import jax.numpy as jnp
from jax.experimental import pallas as pl
from jax.experimental.pallas import tpu as pltpu

IN_F, H1, H2, OUT_F = 28 * 28, 128, 64, 10
H_PAD = 128     # layer-2 width padded to a full lane tile
OUT_PAD = 128   # lane-dense output tile; sliced back to 10 in the wrapper


def mlp_kernel(x_ref, w1_ref, b1_ref, w2_ref, b2_ref, w3_ref, b3_ref, o_ref):
    # f32 x tile -> bf16 in-kernel (VPU), MXU matmuls with f32 accumulation,
    # bias-add / ReLU in f32, bf16 store.
    x = x_ref[...].astype(jnp.bfloat16)

    h1 = jnp.dot(x, w1_ref[...], preferred_element_type=jnp.float32)
    h1 = jnp.maximum(h1 + b1_ref[...], 0.0)

    h2 = jnp.dot(h1.astype(jnp.bfloat16), w2_ref[...],
                 preferred_element_type=jnp.float32)
    h2 = jnp.maximum(h2 + b2_ref[...], 0.0)

    h3 = jnp.dot(h2.astype(jnp.bfloat16), w3_ref[...],
                 preferred_element_type=jnp.float32)
    o_ref[...] = (h3 + b3_ref[...]).astype(o_ref.dtype)


def prepare_params(params):
    """One-time weight prep: bf16 cast + zero-pad H2->128 and OUT->128.
    Call once (or keep as jit constants); do NOT rebuild per forward."""
    w1, b1, w2, b2, w3, b3 = params
    w1b = w1.astype(jnp.bfloat16)                                   # (784, 128)
    b1r = b1.reshape(1, H1).astype(jnp.float32)                     # (1, 128)
    w2p = jnp.zeros((H1, H_PAD), jnp.bfloat16).at[:, :H2].set(
        w2.astype(jnp.bfloat16))                                    # (128, 128)
    b2p = jnp.zeros((1, H_PAD), jnp.float32).at[:, :H2].set(
        b2.reshape(1, H2).astype(jnp.float32))                      # (1, 128)
    w3p = jnp.zeros((H_PAD, OUT_PAD), jnp.bfloat16).at[:H2, :OUT_F].set(
        w3.astype(jnp.bfloat16))                                    # (128, 128)
    b3p = jnp.zeros((1, OUT_PAD), jnp.float32).at[:, :OUT_F].set(
        b3.reshape(1, OUT_F).astype(jnp.float32))                   # (1, 128)
    return (w1b, b1r, w2p, b2p, w3p, b3p)


def simple_nn_forward(x, prepared_params, *, tb=None):
    """x: (B, 1, 28, 28) or anything flattening to (B, 784) f32. Returns (B, 10) f32."""
    w1b, b1r, w2p, b2p, w3p, b3p = prepared_params
    x2d = x.reshape(-1, IN_F)          # mirrors torch's x.view(-1, 28*28)
    B = x2d.shape[0]

    # Tile heuristic:
    #   * small batch -> one step covering the whole batch (no padded work),
    #   * large batch -> up to 1024 rows/step (near HBM roofline, safe in v5e's
    #     16 MiB scoped-VMEM default), but <= B//2 so v7x's two TCs both get work.
    if tb is None:
        if B < 256:
            tb = B
        else:
            tb = min(1024, max(128, (B // 2) // 128 * 128))
    grid = (pl.cdiv(B, tb),)           # edge block masked if B % tb != 0

    # Weights/biases: same block every grid step -> DMA'd once, VMEM-resident.
    def resident(shape):
        return pl.BlockSpec(shape, lambda i: (0,) * len(shape))

    out = pl.pallas_call(
        mlp_kernel,
        out_shape=jax.ShapeDtypeStruct((B, OUT_PAD), jnp.bfloat16),
        grid_spec=pl.GridSpec(
            grid=grid,
            in_specs=[
                pl.BlockSpec((tb, IN_F), lambda i: (i, 0)),   # streamed f32 x tile
                resident((IN_F, H1)),
                resident((1, H1)),
                resident((H1, H_PAD)),
                resident((1, H_PAD)),
                resident((H_PAD, OUT_PAD)),
                resident((1, OUT_PAD)),
            ],
            out_specs=pl.BlockSpec((tb, OUT_PAD), lambda i: (i, 0)),
        ),
        compiler_params=pltpu.CompilerParams(
            dimension_semantics=("parallel",),   # shard batch tiles across TCs (v7x)
        ),
    )(x2d, w1b, b1r, w2p, b2p, w3p, b3p)

    # Tiny slice/cast; ideally the consumer would read the padded bf16 slab directly.
    return out[:B, :OUT_F].astype(jnp.float32)


def init_params(key):
    """PyTorch nn.Linear default init: U(-1/sqrt(fan_in), +1/sqrt(fan_in)).
    Weights stored as (in, out) so the kernel computes x @ W (== torch x @ W.T)."""
    def linear(k, fan_in, fan_out):
        kw, kb = jax.random.split(k)
        bound = 1.0 / jnp.sqrt(fan_in)
        w = jax.random.uniform(kw, (fan_in, fan_out), jnp.float32, -bound, bound)
        b = jax.random.uniform(kb, (1, fan_out), jnp.float32, -bound, bound)
        return w, b

    k1, k2, k3 = jax.random.split(key, 3)
    w1, b1 = linear(k1, IN_F, H1)
    w2, b2 = linear(k2, H1, H2)
    w3, b3 = linear(k3, H2, OUT_F)
    return (w1, b1, w2, b2, w3, b3)


if __name__ == "__main__":
    key = jax.random.PRNGKey(0)
    k_params, k_x = jax.random.split(key)

    params = init_params(k_params)
    prepared = prepare_params(params)   # one-time pad/cast, reused across calls

    # Small MNIST-like batch: (B, C, H, W) = (8, 1, 28, 28)
    x = jax.random.normal(k_x, (8, 1, 28, 28), jnp.float32)

    out = simple_nn_forward(x, prepared)
    out = jax.block_until_ready(out)
    assert out.shape == (8, OUT_F)

    # Reference in plain JAX mirroring the kernel's bf16-operand / f32-accumulate
    # math and bf16 output store (validates parity with the kernel's reduced-precision
    # path; true-f32 PyTorch differs only by bf16 rounding of x and logits).
    w1, b1, w2, b2, w3, b3 = params
    bf = lambda a: a.astype(jnp.bfloat16).astype(jnp.float32)
    x2d = x.reshape(-1, IN_F)
    h1 = jnp.maximum(bf(x2d) @ bf(w1) + b1, 0.0)
    h2 = jnp.maximum(bf(h1) @ bf(w2) + b2, 0.0)
    ref = bf(h2) @ bf(w3) + b3
    ref = ref.astype(jnp.bfloat16).astype(jnp.float32)   # kernel stores bf16

    assert jnp.allclose(out, ref, atol=3e-2, rtol=3e-2), (
        float(jnp.max(jnp.abs(out - ref))))

    print("KERNEL_OK")
</pallas_src>

<mosaic_0001>
module attributes {stable_mosaic.version = 11 : i64} {
  func.func @mlp_kernel(%arg0: i32, %arg1: memref<8x784xf32, #tpu.memory_space<vmem>>, %arg2: memref<784x128xbf16, #tpu.memory_space<vmem>>, %arg3: memref<1x128xf32, #tpu.memory_space<vmem>>, %arg4: memref<128x128xbf16, #tpu.memory_space<vmem>>, %arg5: memref<1x128xf32, #tpu.memory_space<vmem>>, %arg6: memref<128x128xbf16, #tpu.memory_space<vmem>>, %arg7: memref<1x128xf32, #tpu.memory_space<vmem>>, %arg8: memref<8x128xbf16, #tpu.memory_space<vmem>>) attributes {dimension_semantics = [#tpu.dimension_semantics<parallel>], iteration_bounds = array<i64: 1>, scalar_prefetch = 0 : i64, scratch_operands = 0 : i64, tpu.core_type = #tpu.core_type<tc>, window_params = [{transform_indices = @transform_0, window_bounds = array<i64: 8, 784>}, {pipeline_mode = #tpu.pipeline_mode<synchronous>, transform_indices = @transform_1, window_bounds = array<i64: 784, 128>}, {pipeline_mode = #tpu.pipeline_mode<synchronous>, transform_indices = @transform_2, window_bounds = array<i64: 1, 128>}, {pipeline_mode = #tpu.pipeline_mode<synchronous>, transform_indices = @transform_3, window_bounds = array<i64: 128, 128>}, {pipeline_mode = #tpu.pipeline_mode<synchronous>, transform_indices = @transform_4, window_bounds = array<i64: 1, 128>}, {pipeline_mode = #tpu.pipeline_mode<synchronous>, transform_indices = @transform_5, window_bounds = array<i64: 128, 128>}, {pipeline_mode = #tpu.pipeline_mode<synchronous>, transform_indices = @transform_6, window_bounds = array<i64: 1, 128>}, {transform_indices = @transform_7, window_bounds = array<i64: 8, 128>}]} {
    %c0 = arith.constant 0 : index
    %c0_0 = arith.constant 0 : index
    %0 = vector.load %arg1[%c0, %c0_0] : memref<8x784xf32, #tpu.memory_space<vmem>>, vector<8x784xf32>
    %1 = arith.truncf %0 : vector<8x784xf32> to vector<8x784xbf16>
    %c0_1 = arith.constant 0 : index
    %c0_2 = arith.constant 0 : index
    %2 = vector.load %arg2[%c0_1, %c0_2] : memref<784x128xbf16, #tpu.memory_space<vmem>>, vector<784x128xbf16>
    %cst = arith.constant dense<0.000000e+00> : vector<8x128xf32>
    %3 = tpu.matmul %1, %2, %cst {dimension_numbers = #tpu.dot_dimension_numbers<[1], [0], [0], [1], [0, 0, 1, 1], [], []>} : vector<8x784xbf16>, vector<784x128xbf16>, vector<8x128xf32> -> vector<8x128xf32>
    %c0_3 = arith.constant 0 : index
    %c0_4 = arith.constant 0 : index
    %4 = vector.load %arg3[%c0_3, %c0_4] : memref<1x128xf32, #tpu.memory_space<vmem>>, vector<1x128xf32>
    %5 = vector.broadcast %4 : vector<1x128xf32> to vector<8x128xf32>
    %6 = arith.addf %3, %5 : vector<8x128xf32>
    %cst_5 = arith.constant 0.000000e+00 : f32
    %7 = vector.broadcast %cst_5 : f32 to vector<8x128xf32>
    %8 = arith.maximumf %6, %7 : vector<8x128xf32>
    %9 = arith.truncf %8 : vector<8x128xf32> to vector<8x128xbf16>
    %c0_6 = arith.constant 0 : index
    %c0_7 = arith.constant 0 : index
    %10 = vector.load %arg4[%c0_6, %c0_7] : memref<128x128xbf16, #tpu.memory_space<vmem>>, vector<128x128xbf16>
    %cst_8 = arith.constant dense<0.000000e+00> : vector<8x128xf32>
    %11 = tpu.matmul %9, %10, %cst_8 {dimension_numbers = #tpu.dot_dimension_numbers<[1], [0], [0], [1], [0, 0, 1, 1], [], []>} : vector<8x128xbf16>, vector<128x128xbf16>, vector<8x128xf32> -> vector<8x128xf32>
    %c0_9 = arith.constant 0 : index
    %c0_10 = arith.constant 0 : index
    %12 = vector.load %arg5[%c0_9, %c0_10] : memref<1x128xf32, #tpu.memory_space<vmem>>, vector<1x128xf32>
    %13 = vector.broadcast %12 : vector<1x128xf32> to vector<8x128xf32>
    %14 = arith.addf %11, %13 : vector<8x128xf32>
    %cst_11 = arith.constant 0.000000e+00 : f32
    %15 = vector.broadcast %cst_11 : f32 to vector<8x128xf32>
    %16 = arith.maximumf %14, %15 : vector<8x128xf32>
    %17 = arith.truncf %16 : vector<8x128xf32> to vector<8x128xbf16>
    %c0_12 = arith.constant 0 : index
    %c0_13 = arith.constant 0 : index
    %18 = vector.load %arg6[%c0_12, %c0_13] : memref<128x128xbf16, #tpu.memory_space<vmem>>, vector<128x128xbf16>
    %cst_14 = arith.constant dense<0.000000e+00> : vector<8x128xf32>
    %19 = tpu.matmul %17, %18, %cst_14 {dimension_numbers = #tpu.dot_dimension_numbers<[1], [0], [0], [1], [0, 0, 1, 1], [], []>} : vector<8x128xbf16>, vector<128x128xbf16>, vector<8x128xf32> -> vector<8x128xf32>
    %c0_15 = arith.constant 0 : index
    %c0_16 = arith.constant 0 : index
    %20 = vector.load %arg7[%c0_15, %c0_16] : memref<1x128xf32, #tpu.memory_space<vmem>>, vector<1x128xf32>
    %21 = vector.broadcast %20 : vector<1x128xf32> to vector<8x128xf32>
    %22 = arith.addf %19, %21 : vector<8x128xf32>
    %23 = arith.truncf %22 : vector<8x128xf32> to vector<8x128xbf16>
    %c0_17 = arith.constant 0 : index
    %c0_18 = arith.constant 0 : index
    %24 = vector.load %arg8[%c0_17, %c0_18] : memref<8x128xbf16, #tpu.memory_space<vmem>>, vector<8x128xbf16>
    tpu.vector_store %arg8[%c0_17, %c0_18], %23 {strides = array<i32>} : memref<8x128xbf16, #tpu.memory_space<vmem>>, vector<8x128xbf16>,
    return
  }
  func.func @transform_0(%arg0: i32) -> (i32, i32) {
    %c0_i32 = arith.constant 0 : i32
    %c0_i32_0 = arith.constant 0 : i32
    return %arg0, %c0_i32 : i32, i32
  }
  func.func @transform_1(%arg0: i32) -> (i32, i32) {
    %c0_i32 = arith.constant 0 : i32
    %c0_i32_0 = arith.constant 0 : i32
    %c0_i32_1 = arith.constant 0 : i32
    return %c0_i32, %c0_i32_0 : i32, i32
  }
  func.func @transform_2(%arg0: i32) -> (i32, i32) {
    %c0_i32 = arith.constant 0 : i32
    %c0_i32_0 = arith.constant 0 : i32
    %c0_i32_1 = arith.constant 0 : i32
    return %c0_i32, %c0_i32_0 : i32, i32
  }
  func.func @transform_3(%arg0: i32) -> (i32, i32) {
    %c0_i32 = arith.constant 0 : i32
    %c0_i32_0 = arith.constant 0 : i32
    %c0_i32_1 = arith.constant 0 : i32
    return %c0_i32, %c0_i32_0 : i32, i32
  }
  func.func @transform_4(%arg0: i32) -> (i32, i32) {
    %c0_i32 = arith.constant 0 : i32
    %c0_i32_0 = arith.constant 0 : i32
    %c0_i32_1 = arith.constant 0 : i32
    return %c0_i32, %c0_i32_0 : i32, i32
  }
  func.func @transform_5(%arg0: i32) -> (i32, i32) {
    %c0_i32 = arith.constant 0 : i32
    %c0_i32_0 = arith.constant 0 : i32
    %c0_i32_1 = arith.constant 0 : i32
    return %c0_i32, %c0_i32_0 : i32, i32
  }
  func.func @transform_6(%arg0: i32) -> (i32, i32) {
    %c0_i32 = arith.constant 0 : i32
    %c0_i32_0 = arith.constant 0 : i32
    %c0_i32_1 = arith.constant 0 : i32
    return %c0_i32, %c0_i32_0 : i32, i32
  }
  func.func @transform_7(%arg0: i32) -> (i32, i32) {
    %c0_i32 = arith.constant 0 : i32
    %c0_i32_0 = arith.constant 0 : i32
    return %arg0, %c0_i32 : i32, i32
  }
}

</mosaic_0001>

<bundles_post_ra>
// kernel: tpu_custom_call.1
= control target key start
LH: loop header
LB: loop body
LE: loop exit
PB: predicated region body
PF: predicated region fallthrough
CT: control target
= control target key end

     0   :  { %12 = vsyncpa [#allocation3], 0  ;;  %s1446_s0 = inlined_call_operand.hbm [shape: f32[8,784], index: 0, kind: input, shape index: {}]   ;;  %s1447_s1 = inlined_call_operand.hbm [shape: bf16[784,128], index: 1, kind: input, shape index: {}]   ;;  %s1448_s2 = inlined_call_operand.vmem [shape: f32[1,128], index: 2, kind: input, shape index: {}]   ;;  %s1449_s3 = inlined_call_operand.hbm [shape: bf16[128,128], index: 3, kind: input, shape index: {}]   ;;  %s1450_s4 = inlined_call_operand.vmem [shape: f32[1,128], index: 4, kind: input, shape index: {}]   ;;  %s1451_s5 = inlined_call_operand.hbm [shape: bf16[128,128], index: 5, kind: input, shape index: {}]   ;;  %s1452_s6 = inlined_call_operand.vmem [shape: f32[1,128], index: 6, kind: input, shape index: {}]   ;;  %s1453_s7 = inlined_call_operand.hbm [shape: bf16[8,128], index: 7, kind: output, shape index: {}]  }
   0x1   :  { %13 = vsyncpa [#allocation6], 0 }
   0x2   :  { %14 = vsyncpa [#allocation9], 0 }
   0x3   :  { %15 = vsyncpa [#allocation4], 0  ;;  %s1296_s24 = smov [#allocation5]   ;;  %s1178_s28 = scalar_lea.hbm %s1447_s1, 6272 }
   0x4   :  { %s31_s25 = sshll.u32 %s1296_s24, 4  ;;  %p1179_p0 = scmp.ne.s32.totalorder %s1447_s1, %s1178_s28  ;;  %s32_s25 = int_to_ptr.vmem [resolvable:$true] %s31_s25 }
   0x5   :  { %p1182_p1 = scmp.lt.u32.totalorder %s1178_s28, %s1447_s1 }
   0x7   :  { %p1184_p2 = pnand %p1182_p1, %p1179_p0 }
   0x9   :  { %1187 = shalt.err (!%p1184_p2)
}
   0xa   :  { %s1188_s10 = scalar_lea.vmem %s32_s25, 6272  ;;  %p1193_p4 = scmp.lt.s32.totalorder %s32_s25, %s32_s25 }
   0xb   :  { %p1189_p3 = scmp.ne.s32.totalorder %s32_s25, %s1188_s10  ;;  %p1194_p5 = scmp.lt.s32.totalorder %s1188_s10, %s1188_s10 }
   0xd   :  { %p1195_p6 = por %p1194_p5, %p1193_p4 }
   0xf   :  { %p1196_p7 = pnand %p1195_p6, %p1189_p3 }
  0x11   :  { %1199 = shalt.err (!%p1196_p7)
}
  0x12   :  { %s1297_s11 = smov 64   ;;  %s1298_s12 = smov 4  }
  0x13   :  { %37 = dma.hbm_to_vmem [thread:$0]  %s1447_s1, 6272, %s32_s25, [#allocation6], %s1297_s11, %s1297_s11, %s1298_s12  }
  0x14   :  { %s1299_s15 = smov [#allocation2]   ;;  %s1300_s17 = smov [#allocation7]  }
  0x15   :  { %s22_s16 = sshll.u32 %s1299_s15, 4  ;;  %s45_s18 = sshll.u32 %s1300_s17, 4  ;;  %s23_s16 = int_to_ptr.vmem [resolvable:$true] %s22_s16  ;;  %s46_s18 = int_to_ptr.vmem [resolvable:$true] %s45_s18 }
  0x16   :  { %s1200_s21 = scalar_lea.hbm %s1446_s0, 896 }
  0x17   :  { %p1201_p8 = scmp.ne.s32.totalorder %s1446_s0, %s1200_s21  ;;  %p1204_p9 = scmp.lt.u32.totalorder %s1200_s21, %s1446_s0 }
  0x19   :  { %p1206_p10 = pnand %p1204_p9, %p1201_p8 }
  0x1b   :  { %1209 = shalt.err (!%p1206_p10)
}
  0x1c   :  { %s1210_s1 = scalar_lea.vmem %s23_s16, 896  ;;  %p1215_p12 = scmp.lt.s32.totalorder %s23_s16, %s23_s16 }
  0x1d   :  { %p1211_p11 = scmp.ne.s32.totalorder %s23_s16, %s1210_s1  ;;  %p1216_p13 = scmp.lt.s32.totalorder %s1210_s1, %s1210_s1 }
  0x1f   :  { %p1217_p0 = por %p1216_p13, %p1215_p12 }
  0x21   :  { %p1218_p1 = pnand %p1217_p0, %p1211_p11 }
  0x23   :  { %1221 = shalt.err (!%p1218_p1)
}
  0x24   :  { %25 = dma.hbm_to_vmem [thread:$0]  %s1446_s0, 896, %s23_s16, [#allocation3]  }
  0x25   :  { %s1222_s30 = scalar_lea.hbm %s1449_s3, 1024 }
  0x26   :  { %p1223_p2 = scmp.ne.s32.totalorder %s1449_s3, %s1222_s30  ;;  %p1226_p3 = scmp.lt.u32.totalorder %s1222_s30, %s1449_s3 }
  0x28   :  { %p1228_p4 = pnand %p1226_p3, %p1223_p2 }
  0x2a   :  { %1231 = shalt.err (!%p1228_p4)
}
  0x2b   :  { %s1232_s14 = scalar_lea.vmem %s46_s18, 1024  ;;  %p1237_p6 = scmp.lt.s32.totalorder %s46_s18, %s46_s18 }
  0x2c   :  { %p1233_p5 = scmp.ne.s32.totalorder %s46_s18, %s1232_s14  ;;  %p1238_p7 = scmp.lt.s32.totalorder %s1232_s14, %s1232_s14 }
  0x2e   :  { %p1239_p8 = por %p1238_p7, %p1237_p6 }
  0x30   :  { %p1240_p9 = pnand %p1239_p8, %p1233_p5 }
  0x32   :  { %1243 = shalt.err (!%p1240_p9)
}
  0x33   :  { %51 = dma.hbm_to_vmem [thread:$0]  %s1449_s3, 1024, %s46_s18, [#allocation6], %s1297_s11, %s1297_s11, %s1298_s12  }
  0x34   :  { %s1301_s16 = smov [#allocation8]   ;;  %s1244_s21 = scalar_lea.hbm %s1451_s5, 1024 }
  0x35   :  { %s59_s17 = sshll.u32 %s1301_s16, 4  ;;  %p1245_p10 = scmp.ne.s32.totalorder %s1451_s5, %s1244_s21  ;;  %s60_s17 = int_to_ptr.vmem [resolvable:$true] %s59_s17 }
  0x36   :  { %p1248_p11 = scmp.lt.u32.totalorder %s1244_s21, %s1451_s5 }
  0x38   :  { %p1250_p12 = pnand %p1248_p11, %p1245_p10 }
  0x3a   :  { %1253 = shalt.err (!%p1250_p12)
}
  0x3b   :  { %s1254_s1 = scalar_lea.vmem %s60_s17, 1024  ;;  %p1259_p0 = scmp.lt.s32.totalorder %s60_s17, %s60_s17 }
  0x3c   :  { %p1255_p13 = scmp.ne.s32.totalorder %s60_s17, %s1254_s1  ;;  %p1260_p1 = scmp.lt.s32.totalorder %s1254_s1, %s1254_s1 }
  0x3e   :  { %p1261_p2 = por %p1260_p1, %p1259_p0 }
  0x40   :  { %p1262_p3 = pnand %p1261_p2, %p1255_p13 }
  0x42   :  { %1265 = shalt.err (!%p1262_p3)
}
  0x43   :  { %65 = dma.hbm_to_vmem [thread:$0]  %s1451_s5, 1024, %s60_s17, [#allocation9], %s1297_s11, %s1297_s11, %s1298_s12  }
  0x44   :  { %1288 = dma.done.wait [#allocation3], 896  }
  0x45   :  { %1289 = vsyncadd [#allocation3], 4294966400 }
  0x46   :  { %1290 = dma.done.wait [#allocation6], 7296  }
  0x47   :  { %1291 = vsyncadd [#allocation6], 4294960000 }
  0x48   :  { %1292 = dma.done.wait [#allocation9], 1024  }
  0x49   :  { %1293 = vsyncadd [#allocation9], 4294966272  ;;  %v1113_v0 = vld [vmem:[#allocation5 + $0x40] sm:$0xff]   ;;  %v1117_v4 = vld [vmem:[#allocation5 + $0x48] sm:$0xff]   ;;  %v1302_v44 = vmov 0.0   ;;  %vm1303_vm0 = vmmov 0  }
  0x4a   :  { %v1114_v1 = vld [vmem:[#allocation5] sm:$0xff]   ;;  %972 = vmatprep.subr.bf16.mxu0 %v1113_v0  ;;  %v1118_v5 = vld [vmem:[#allocation5 + $0x8] sm:$0xff]   ;;  %v1121_v8 = vld [vmem:[#allocation5 + $0x50] sm:$0xff]   ;;  %vm494_vm1 = vcmask 130048   ;;  %s1304_s28 = smov [#allocation10]  }
  0x4b   :  { %v1115_v2 = vld [vmem:[#allocation5 + $0xc0] sm:$0xff]   ;;  %973 = vmatpush3.bf16.msra.mxu0 %v1114_v1  ;;  %v1119_v6 = vld [vmem:[#allocation5 + $0xc8] sm:$0xff]   ;;  %v1122_v9 = vld [vmem:[#allocation5 + $0x10] sm:$0xff]   ;;  %s892_s29 = sshll.u32 %s1304_s28, 4  ;;  %s893_s29 = int_to_ptr.vmem [resolvable:$true] %s892_s29 }
  0x4c   :  { %v1116_v3 = vld [vmem:[#allocation5 + $0x80] sm:$0xff]   ;;  %994 = vmatprep.subr.bf16.mxu1 %v1115_v2  ;;  %974 = vmatprep.subr.bf16.mxu0 %v1117_v4  ;;  %v1120_v7 = vld [vmem:[#allocation5 + $0x88] sm:$0xff]   ;;  %v1123_v10 = vld [vmem:[#allocation5 + $0xd0] sm:$0xff]   ;;  %p1271_p5 = scmp.lt.s32.totalorder %s893_s29, %s893_s29 }
  0x4d   :  { %995 = vmatpush3.bf16.msra.mxu1 %v1116_v3  ;;  %v1124_v11 = vld [vmem:[#allocation5 + $0x90] sm:$0xff]   ;;  %v1125_v12 = vld [vmem:[#allocation5 + $0x58] sm:$0xff]   ;;  %v1129_v16 = vld [vmem:[#allocation5 + $0x60] sm:$0xff]  }
  0x4e   :  { %996 = vmatprep.subr.bf16.mxu1 %v1119_v6  ;;  %v1126_v13 = vld [vmem:[#allocation5 + $0x18] sm:$0xff]   ;;  %v1130_v17 = vld [vmem:[#allocation5 + $0x20] sm:$0xff]   ;;  %v1133_v20 = vld [vmem:[#allocation5 + $0x68] sm:$0xff]  }
  0x4f   :  { %975 = vmatpush3.bf16.msra.mxu0 %v1118_v5  ;;  %v1127_v14 = vld [vmem:[#allocation5 + $0xd8] sm:$0xff]   ;;  %v1131_v18 = vld [vmem:[#allocation5 + $0xe0] sm:$0xff]   ;;  %v1134_v21 = vld [vmem:[#allocation5 + $0x28] sm:$0xff]  }
  0x50   :  { %976 = vmatprep.subr.bf16.mxu0 %v1121_v8  ;;  %v1128_v15 = vld [vmem:[#allocation5 + $0x98] sm:$0xff]   ;;  %v1132_v19 = vld [vmem:[#allocation5 + $0xa0] sm:$0xff]   ;;  %v1135_v22 = vld [vmem:[#allocation5 + $0xe8] sm:$0xff]  }
  0x51   :  { %997 = vmatpush3.bf16.msra.mxu1 %v1120_v7  ;;  %v1136_v23 = vld [vmem:[#allocation5 + $0xa8] sm:$0xff]   ;;  %v1137_v24 = vld [vmem:[#allocation5 + $0x70] sm:$0xff]   ;;  %v1141_v28 = vld [vmem:[#allocation5 + $0x78] sm:$0xff]  }
  0x52   :  { %998 = vmatprep.subr.bf16.mxu1 %v1123_v10  ;;  %v1138_v25 = vld [vmem:[#allocation5 + $0x30] sm:$0xff]   ;;  %v1142_v29 = vld [vmem:[#allocation5 + $0x38] sm:$0xff]   ;;  %v81_v34 = vld [vmem:[#allocation2] sm:$0xff] }
  0x53   :  { %977 = vmatpush3.bf16.msra.mxu0 %v1122_v9  ;;  %v1139_v26 = vld [vmem:[#allocation5 + $0xf0] sm:$0xff]   ;;  %v1143_v30 = vld [vmem:[#allocation5 + $0xf8] sm:$0xff]   ;;  %v88_v35 = vpack.c.bf16 %v81_v34, %v81_v34  ;;  %v1145_v36 = vld [vmem:[#allocation5 + $0x140] sm:$0xff]  }
  0x54   :  { %978 = vmatprep.subr.bf16.mxu0 %v1125_v12  ;;  %v1140_v27 = vld [vmem:[#allocation5 + $0xb0] sm:$0xff]   ;;  %v1144_v33 = vld [vmem:[#allocation5 + $0xb8] sm:$0xff]   ;;  %v84_v37 = vld [vmem:[#allocation2 + $0x18] sm:$0xff] }
  0x55   :  { %999 = vmatpush3.bf16.msra.mxu1 %v1124_v11  ;;  %v82_v31 = vld [vmem:[#allocation2 + $0x8] sm:$0xff]  ;;  %v91_v38 = vpack.c.bf16 %v84_v37, %v84_v37  ;;  %v1146_v39 = vld [vmem:[#allocation5 + $0x100] sm:$0xff]   ;;  %v83_v40 = vld [vmem:[#allocation2 + $0x10] sm:$0xff] }
  0x56   :  { %1000 = vmatprep.subr.bf16.mxu1 %v1127_v14  ;;  %v89_v32 = vpack.c.bf16 %v82_v31, %v82_v31  ;;  %v90_v41 = vpack.c.bf16 %v83_v40, %v83_v40  ;;  %v1147_v42 = vld [vmem:[#allocation5 + $0x148] sm:$0xff]   ;;  %v1149_v45 = vld [vmem:[#allocation5 + $0x150] sm:$0xff]   ;;  %v1151_v47 = vld [vmem:[#allocation5 + $0x158] sm:$0xff]  }
  0x57   :  { %979 = vmatpush3.bf16.msra.mxu0 %v1126_v13  ;;  %570 = vmatprep.mubr.bf16.mxu1 %v91_v38  ;;  %v1148_v43 = vld [vmem:[#allocation5 + $0x108] sm:$0xff]   ;;  %v1150_v46 = vld [vmem:[#allocation5 + $0x110] sm:$0xff]   ;;  %v1152_v48 = vld [vmem:[#allocation5 + $0x118] sm:$0xff]  }
  0x58   :  { %980 = vmatprep.subr.bf16.mxu0 %v1129_v16  ;;  %530 = vmatprep.mubr.bf16.mxu0 %v89_v32  ;;  %v1153_v49 = vld [vmem:[#allocation5 + $0x160] sm:$0xff]   ;;  %v1155_v51 = vld [vmem:[#allocation5 + $0x168] sm:$0xff]   ;;  %v86_v54 = vld [vmem:[#allocation2 + $0x28] sm:$0xff] }
  0x59   :  { %1001 = vmatpush3.bf16.msra.mxu1 %v1128_v15  ;;  %v1154_v50 = vld [vmem:[#allocation5 + $0x120] sm:$0xff]   ;;  %v1156_v52 = vld [vmem:[#allocation5 + $0x128] sm:$0xff]   ;;  %v1157_v55 = vld [vmem:[#allocation5 + $0x170] sm:$0xff]   ;;  %v93_v56 = vpack.c.bf16 %v86_v54, %v86_v54 }
  0x5a   :  { %1002 = vmatprep.subr.bf16.mxu1 %v1131_v18  ;;  %v1161_v53 = vld [vmem:[#allocation5 + $0x180] sm:$0xff]   ;;  %v87_v57 = vld [vmem:[#allocation2 + $0x30] sm:$0xff]  ;;  %v1158_v59 = vld [vmem:[#allocation5 + $0x130] sm:$0xff]  }
  0x5b   :  { %981 = vmatpush3.bf16.msra.mxu0 %v1130_v17  ;;  %v94_v58 = vpack.c.bf16 %v87_v57, %v87_v57  ;;  %v1159_v60 = vld [vmem:[#allocation5 + $0x178] sm:$0xff]   ;;  %v85_v62 = vld [vmem:[#allocation2 + $0x20] sm:$0xff]  ;;  %v1163_v1 = vld [vmem:[#allocation7 + $0x8] sm:$0xff]  }
  0x5c   :  { %982 = vmatprep.subr.bf16.mxu0 %v1133_v20  ;;  %v1160_v61 = vld [vmem:[#allocation5 + $0x138] sm:$0xff]   ;;  %v92_v63 = vpack.c.bf16 %v85_v62, %v85_v62  ;;  %v1162_v0 = vld [vmem:[#allocation7] sm:$0xff]   ;;  %v1165_v3 = vld [vmem:[#allocation7 + $0x18] sm:$0xff]  }
  0x5d   :  { %1003 = vmatpush3.bf16.msra.mxu1 %v1132_v19  ;;  %v1164_v2 = vld [vmem:[#allocation7 + $0x10] sm:$0xff]   ;;  %v1166_v4 = vld [vmem:[#allocation7 + $0x20] sm:$0xff]   ;;  %v1167_v5 = vld [vmem:[#allocation7 + $0x28] sm:$0xff]  }
  0x5e   :  { %1004 = vmatprep.subr.bf16.mxu1 %v1135_v22  ;;  %v1168_v6 = vld [vmem:[#allocation7 + $0x30] sm:$0xff]   ;;  %v1169_v7 = vld [vmem:[#allocation7 + $0x38] sm:$0xff]   ;;  %v1170_v8 = vld [vmem:[#allocation8] sm:$0xff]  }
  0x5f   :  { %983 = vmatpush3.bf16.msra.mxu0 %v1134_v21  ;;  %v1171_v9 = vld [vmem:[#allocation8 + $0x8] sm:$0xff]   ;;  %v1172_v10 = vld [vmem:[#allocation8 + $0x10] sm:$0xff]   ;;  %v1173_v11 = vld [vmem:[#allocation8 + $0x18] sm:$0xff]  }
  0x60   :  { %984 = vmatprep.subr.bf16.mxu0 %v1137_v24  ;;  %v1174_v12 = vld [vmem:[#allocation8 + $0x20] sm:$0xff]   ;;  %v1175_v13 = vld [vmem:[#allocation8 + $0x28] sm:$0xff]   ;;  %v1176_v40 = vld [vmem:[#allocation8 + $0x30] sm:$0xff]  }
  0x61   :  { %1005 = vmatpush3.bf16.msra.mxu1 %v1136_v23  ;;  %v903_v15 = vld [vmem:[%s1448_s2] ss:$0 sm:$0xff] }
  0x62   :  { %1006 = vmatprep.subr.bf16.mxu1 %v1139_v26 }
  0x63   :  { %985 = vmatpush3.bf16.msra.mxu0 %v1138_v25 }
  0x64   :  { %986 = vmatprep.subr.bf16.mxu0 %v1141_v28 }
  0x65   :  { %1007 = vmatpush3.bf16.msra.mxu1 %v1140_v27 }
  0x66   :  { %1008 = vmatprep.subr.bf16.mxu1 %v1143_v30 }
  0x67   :  { %987 = vmatpush3.bf16.msra.mxu0 %v1142_v29 }
  0x68   :  { %1016 = vmatprep.subr.bf16.mxu0 %v1145_v36 }
  0x69   :  { %1009 = vmatpush3.bf16.msra.mxu1 %v1144_v33 }
  0x6a   :  { %531 = vmatmul.mubr.bf16.vlgmr.msra.gmra.mrb[0].mxu0 %v88_v35  ;;  %1058 = vmatprep.subr.bf16.mxu1 %v1302_v44 }
  0x6b   :  { %1017 = vmatpush3.bf16.msra.mxu0 %v1146_v39  ;;  %610 = vmatprep.mubr.bf16.mxu0 %v93_v56 }
  0x6c   :  { %571 = vmatmul.mubr.bf16.vlgmr.msra.gmra.mrb[0].mxu1 %v90_v41  ;;  %1018 = vmatprep.subr.bf16.mxu0 %v1147_v42  ;;  %v1177_v41 = vld [vmem:[#allocation8 + $0x38] sm:$0xff]   ;;  %v954_v42 = vld [vmem:[%s1450_s4] ss:$0 sm:$0xff]  ;;  %s1266_s4 = scalar_lea.vmem %s893_s29, 64 }
  0x6d   :  { %1060 = vmatprep.mubr.msk.bf16.mxu1 %vm1303_vm0, %v1302_v44  ;;  %1059 = vmatpush3.bf16.msra.mxu1 %v1161_v53  ;;  %p1267_p4 = scmp.ne.s32.totalorder %s893_s29, %s1266_s4  ;;  %p1272_p6 = scmp.lt.s32.totalorder %s1266_s4, %s1266_s4 }
  0x6e   :  { %1064 = vmatprep.subr.bf16.mxu1 %v1302_v44 }
  0x6f   :  { %1019 = vmatpush3.bf16.msra.mxu0 %v1148_v43  ;;  %p1273_p7 = por %p1272_p6, %p1271_p5 }
  0x70   :  { %1020 = vmatprep.subr.bf16.mxu0 %v1149_v45 }
  0x71   :  { %p1274_p8 = pnand %p1273_p7, %p1267_p4 }
  0x73   :  { %1021 = vmatpush3.bf16.msra.mxu0 %v1150_v46 }
  0x74   :  { %1022 = vmatprep.subr.bf16.mxu0 %v1151_v47  ;;  %1061 = vmatmul.mubr.msk.bf16.vlgmr.msra.gmra.mrb[4].mxu1 %vm494_vm1, %v94_v58 }
  0x75   :  { %1080 = vmatprep.mubr.msk.bf16.mxu1 %vm1303_vm0, %v1302_v44  ;;  %1065 = vmatpush3.bf16.msra.mxu1 %v1162_v0 }
  0x76   :  { %1066 = vmatprep.subr.bf16.mxu1 %v1302_v44 }
  0x77   :  { %1023 = vmatpush3.bf16.msra.mxu0 %v1152_v48 }
  0x78   :  { %1024 = vmatprep.subr.bf16.mxu0 %v1153_v49 }
  0x79   :  { %1067 = vmatpush3.bf16.msra.mxu1 %v1163_v1 }
  0x7a   :  { %1068 = vmatprep.subr.bf16.mxu1 %v1302_v44 }
  0x7b   :  { %1025 = vmatpush3.bf16.msra.mxu0 %v1154_v50 }
  0x7c   :  { %1026 = vmatprep.subr.bf16.mxu0 %v1155_v51  ;;  %v963_v51 = vld [vmem:[%s1452_s6] ss:$0 sm:$0xff] }
  0x7d   :  { %1069 = vmatpush3.bf16.msra.mxu1 %v1164_v2 }
  0x7e   :  { %1070 = vmatprep.subr.bf16.mxu1 %v1302_v44 }
  0x7f   :  { %1027 = vmatpush3.bf16.msra.mxu0 %v1156_v52 }
  0x80   :  { %1028 = vmatprep.subr.bf16.mxu0 %v1157_v55 }
  0x81   :  { %1071 = vmatpush3.bf16.msra.mxu1 %v1165_v3 }
  0x82   :  { %1072 = vmatprep.subr.bf16.mxu1 %v1302_v44 }
  0x83   :  { %1029 = vmatpush3.bf16.msra.mxu0 %v1158_v59 }
  0x84   :  { %1030 = vmatprep.subr.bf16.mxu0 %v1159_v60 }
  0x85   :  { %1073 = vmatpush3.bf16.msra.mxu1 %v1166_v4 }
  0x86   :  { %1074 = vmatprep.subr.bf16.mxu1 %v1302_v44 }
  0x87   :  { %1031 = vmatpush3.bf16.msra.mxu0 %v1160_v61 }
  0x88   :  { %1084 = vmatprep.subr.bf16.mxu0 %v1302_v44 }
  0x89   :  { %1075 = vmatpush3.bf16.msra.mxu1 %v1167_v5 }
  0x8a   :  { %611 = vmatmul.mubr.bf16.vlgmr.msra.gmra.mrb[4].mxu0 %v92_v63  ;;  %1076 = vmatprep.subr.bf16.mxu1 %v1302_v44 }
  0x8b   :  { %1100 = vmatprep.mubr.msk.bf16.mxu0 %vm1303_vm0, %v1302_v44  ;;  %1085 = vmatpush3.bf16.msra.mxu0 %v1170_v8 }
  0x8c   :  { %1086 = vmatprep.subr.bf16.mxu0 %v1302_v44 }
  0x8d   :  { %1077 = vmatpush3.bf16.msra.mxu1 %v1168_v6 }
  0x8e   :  { %1078 = vmatprep.subr.bf16.mxu1 %v1302_v44 }
  0x8f   :  { %1087 = vmatpush3.bf16.msra.mxu0 %v1171_v9 }
  0x90   :  { %1088 = vmatprep.subr.bf16.mxu0 %v1302_v44 }
  0x91   :  { %1079 = vmatpush3.bf16.msra.mxu1 %v1169_v7 }
  0x93   :  { %1089 = vmatpush3.bf16.msra.mxu0 %v1172_v10 }
  0x94   :  { %1090 = vmatprep.subr.bf16.mxu0 %v1302_v44 }
  0x97   :  { %1091 = vmatpush3.bf16.msra.mxu0 %v1173_v11 }
  0x98   :  { %1092 = vmatprep.subr.bf16.mxu0 %v1302_v44 }
  0x9b   :  { %1093 = vmatpush3.bf16.msra.mxu0 %v1174_v12 }
  0x9c   :  { %1094 = vmatprep.subr.bf16.mxu0 %v1302_v44 }
  0x9f   :  { %1095 = vmatpush3.bf16.msra.mxu0 %v1175_v13 }
  0xa0   :  { %1096 = vmatprep.subr.bf16.mxu0 %v1302_v44 }
  0xa3   :  { %1097 = vmatpush3.bf16.msra.mxu0 %v1176_v40 }
  0xa4   :  { %1098 = vmatprep.subr.bf16.mxu0 %v1302_v44 }
  0xa7   :  { %1099 = vmatpush3.bf16.msra.mxu0 %v1177_v41 }
 0x13d   :  { %v988_v14 = vpop.f32.mrb[0].mxu0 }
 0x13e   :  { %v989_v16 = vpop.f32.mrb[1].mxu0 }
 0x13f   :  { %v990_v17 = vadd.f32 %v989_v16, %v988_v14  ;;  %v991_v18 = vpop.f32.mrb[2].mxu0  ;;  %v1010_v19 = vpop.f32.mrb[0].mxu1 }
 0x140   :  { %v992_v20 = vpop.f32.mrb[3].mxu0  ;;  %v1011_v22 = vpop.f32.mrb[1].mxu1 }
 0x141   :  { %v533_v21 = vadd.f32 %v990_v17, %v903_v15  ;;  %v1012_v23 = vadd.f32 %v1011_v22, %v1010_v19  ;;  %v1013_v24 = vpop.f32.mrb[2].mxu1 }
 0x142   :  { %v1014_v25 = vpop.f32.mrb[3].mxu1 }
 0x143   :  { %v573_v26 = vadd.f32 %v1012_v23, %v533_v21 }
 0x147   :  { %v652_v27 = vpop.f32.mrb[4].mxu1 }
 0x148   :  { %v1062_v28 = vpop.f32.mrb[5].mxu1 }
 0x149   :  { %v655_v29 = vpop.f32.mrb[6].mxu1 }
 0x14a   :  { %v1063_v30 = vpop.f32.mrb[7].mxu1 }
 0x15d   :  { %v1032_v31 = vpop.f32.mrb[4].mxu0 }
 0x15e   :  { %v1033_v32 = vpop.f32.mrb[5].mxu0 }
 0x15f   :  { %v1034_v33 = vadd.f32 %v1033_v32, %v1032_v31  ;;  %v1035_v34 = vpop.f32.mrb[6].mxu0 }
 0x160   :  { %v1036_v35 = vpop.f32.mrb[7].mxu0 }
 0x161   :  { %v613_v36 = vadd.f32 %v1034_v33, %v573_v26 }
 0x163   :  { %v653_v37 = vadd.f32 %v652_v27, %v613_v36 }
 0x165   :  { %v658_v38 = vmax.f32 %v653_v37, 0.0 }
 0x167   :  { %v659_v39 = vpack.c.bf16 %v658_v38, %v658_v38 }
 0x169   :  { %1081 = vmatmul.mubr.bf16.vlgmr.msra.gmra.mrb[8].mxu1 %v659_v39 }
 0x23c   :  { %v765_v43 = vpop.f32.mrb[8].mxu1 }
 0x23d   :  { %v766_v45 = vadd.f32 %v954_v42, %v765_v43  ;;  %v1082_v46 = vpop.f32.mrb[9].mxu1 }
 0x23e   :  { %v768_v47 = vpop.f32.mrb[10].mxu1 }
 0x23f   :  { %v771_v48 = vmax.f32 %v766_v45, 0.0  ;;  %v1083_v49 = vpop.f32.mrb[11].mxu1 }
 0x241   :  { %v772_v50 = vpack.c.bf16 %v771_v48, %v771_v48 }
 0x243   :  { %1101 = vmatmul.mubr.bf16.vlgmr.msra.gmra.mrb[8].mxu0 %v772_v50 }
 0x316   :  { %v878_v52 = vpop.f32.mrb[8].mxu0 }
 0x317   :  { %v879_v44 = vadd.f32 %v963_v51, %v878_v52  ;;  %v1102_v53 = vpop.f32.mrb[9].mxu0 }
 0x318   :  { %v881_v54 = vpop.f32.mrb[10].mxu0 }
 0x319   :  { %v884_v55 = vpack.c.bf16 %v879_v44, %v879_v44  ;;  %v1103_v56 = vpop.f32.mrb[11].mxu0 }
 0x31b   :  { %885 = vst [vmem:[#allocation10] sm:$0xf] %v884_v55 }
 0x31c   :  { %1277 = shalt.err (!%p1274_p8)
}
 0x31d   :  { %s1278_s6 = scalar_lea.hbm %s1453_s7, 64 }
 0x31e   :  { %p1279_p9 = scmp.ne.s32.totalorder %s1453_s7, %s1278_s6  ;;  %p1282_p10 = scmp.lt.u32.totalorder %s1278_s6, %s1453_s7 }
 0x320   :  { %p1284_p11 = pnand %p1282_p10, %p1279_p9 }
 0x322   :  { %1287 = shalt.err (!%p1284_p11)
}
 0x323   :  { %895 = dma.vmem_to_hbm [thread:$0]  %s893_s29, 64, %s1453_s7, [#allocation4]  }
 0x324   :  { %1294 = dma.done.wait [#allocation4], 64  }
 0x325   :  { %1295 = vsyncadd [#allocation4], 4294967232 }
 0x326   :  { %899 = vsyncpa [#allocation3], 1 }
 0x327   :  { %900 = vsyncpa [#allocation6], 1 }
 0x328   :  { %901 = vsyncpa [#allocation9], 1 }
 0x329   :  { %902 = vsyncpa [#allocation4], 1 }

</bundles_post_ra>
